<compile_context>
chip_gen: v6e
topology: v6e:2x2x1
jax: 0.10.0
libtpu: 0.0.40
codegen_flags: <defaults>
</compile_context>

<pallas_src>
import jax
import jax.numpy as jnp
from jax import lax
from jax.experimental import pallas as pl
from jax.experimental.pallas import tpu as pltpu

BN_EPS = 1e-5
HIDDEN = 128


def _temperature_kernel(scalar_ref, src_ref, tgt_ref, w1_ref, w23_ref, vec_ref,
                        temp_ref, res_ref):
    """Refs:
         scalar_ref : (3,)          f32  SMEM   [1/T, T, b4]
         src_ref    : (B, C, N)     f32  VMEM   source embedding (native layout)
         tgt_ref    : (B, C, N)     f32  VMEM   target embedding (native layout)
         w1_ref     : (C, 128)      bf16 VMEM   first Linear weight (pre-transposed)
         w23_ref    : (2, 128, 128) bf16 VMEM   second / third Linear weights
         vec_ref    : (10, 128)     f32  VMEM   b1,g1,be1,b2,g2,be2,b3,g3,be3,w4
         temp_ref   : (B, 1)        f32  VMEM   clamped temperature
         res_ref    : (B, C)        f32  VMEM   feature disparity (residual)
    """
    n_points = src_ref.shape[-1]
    inv_n = 1.0 / float(n_points)

    # Mean over points: lane reduction over the native minor axis -> (B, C).
    src_m = jnp.sum(src_ref[...], axis=-1) * inv_n
    tgt_m = jnp.sum(tgt_ref[...], axis=-1) * inv_n
    residual = jnp.abs(src_m - tgt_m)
    res_ref[...] = residual.astype(res_ref.dtype)

    def bn_relu(y, g, be):
        # BatchNorm1d in training mode: biased batch statistics over the batch.
        # TODO(synk): eval-mode running statistics are not modeled (matches .train()).
        mu = jnp.mean(y, axis=0, keepdims=True)
        var = jnp.mean(jnp.square(y - mu), axis=0, keepdims=True)
        y = (y - mu) * lax.rsqrt(var + BN_EPS)
        return jnp.maximum(y * g + be, 0.0)

    # Linear(emb_dims -> 128) + BN + ReLU   (bf16 MXU operands, f32 accumulate)
    h = jnp.dot(residual.astype(jnp.bfloat16), w1_ref[...],
                preferred_element_type=jnp.float32) + vec_ref[0:1, :]
    h = bn_relu(h, vec_ref[1:2, :], vec_ref[2:3, :])

    # Linear(128 -> 128) + BN + ReLU
    h = jnp.dot(h.astype(jnp.bfloat16), w23_ref[0],
                preferred_element_type=jnp.float32) + vec_ref[3:4, :]
    h = bn_relu(h, vec_ref[4:5, :], vec_ref[5:6, :])

    # Linear(128 -> 128) + BN + ReLU
    h = jnp.dot(h.astype(jnp.bfloat16), w23_ref[1],
                preferred_element_type=jnp.float32) + vec_ref[6:7, :]
    h = bn_relu(h, vec_ref[7:8, :], vec_ref[8:9, :])

    # Linear(128 -> 1): VPU multiply + lane reduce (single-column MXU matmul
    # would waste the systolic array).
    t = jnp.sum(h * vec_ref[9:10, :], axis=-1, keepdims=True) + scalar_ref[2]
    t = jnp.maximum(t, 0.0)                           # ReLU
    t = jnp.clip(t, scalar_ref[0], scalar_ref[1])     # clamp(1/T, T)
    temp_ref[...] = t.astype(temp_ref.dtype)


def temperature_net_forward(src_embedding, tgt_embedding, params, temp_factor):
    """src/tgt: (B, emb_dims, N) float32.
    Returns (temperature (B, 1), residual (B, emb_dims))."""
    B, C, N = src_embedding.shape
    (w1, b1, g1, be1, w2, b2, g2, be2, w3, b3, g3, be3, w4, b4) = params

    # ---- host-side packing (parameters only; all tiny) -----------------------
    w1p = w1.astype(jnp.bfloat16)                                   # (C, 128)
    w23 = jnp.stack([w2, w3], axis=0).astype(jnp.bfloat16)          # (2, 128, 128)
    vecs = jnp.concatenate(
        [b1, g1, be1, b2, g2, be2, b3, g3, be3,
         jnp.reshape(w4, (1, HIDDEN))], axis=0).astype(jnp.float32)  # (10, 128)

    tf = jnp.asarray(temp_factor, jnp.float32)
    scalars = jnp.stack([1.0 / tf, tf,
                         jnp.reshape(b4, ()).astype(jnp.float32)])   # (3,) SMEM

    vmem = pl.BlockSpec(memory_space=pltpu.MemorySpace.VMEM)
    smem = pl.BlockSpec(memory_space=pltpu.MemorySpace.SMEM)

    temperature, residual = pl.pallas_call(
        _temperature_kernel,
        out_shape=(jax.ShapeDtypeStruct((B, 1), jnp.float32),
                   jax.ShapeDtypeStruct((B, C), jnp.float32)),
        in_specs=[smem, vmem, vmem, vmem, vmem, vmem],
        out_specs=(vmem, vmem),
    )(scalars,
      src_embedding.astype(jnp.float32),
      tgt_embedding.astype(jnp.float32),
      w1p, w23, vecs)

    return temperature, residual


def init_params(key, emb_dims, hidden=HIDDEN):
    """Deterministic parameter init matching the nn.Sequential shapes.
    Linear weights are stored pre-transposed (in_features, out_features)."""
    ks = jax.random.split(key, 4)

    def lin(k, fan_in, fan_out):
        bound = 1.0 / jnp.sqrt(fan_in)
        w = jax.random.uniform(k, (fan_in, fan_out), jnp.float32, -bound, bound)
        kb = jax.random.fold_in(k, 1)
        b = jax.random.uniform(kb, (1, fan_out), jnp.float32, -bound, bound)
        return w, b

    w1, b1 = lin(ks[0], emb_dims, hidden)
    w2, b2 = lin(ks[1], hidden, hidden)
    w3, b3 = lin(ks[2], hidden, hidden)
    w4, b4 = lin(ks[3], hidden, 1)
    # BatchNorm1d affine params (gamma=1, beta=0 at init).
    g1, be1 = jnp.ones((1, hidden), jnp.float32), jnp.zeros((1, hidden), jnp.float32)
    g2, be2 = jnp.ones((1, hidden), jnp.float32), jnp.zeros((1, hidden), jnp.float32)
    g3, be3 = jnp.ones((1, hidden), jnp.float32), jnp.zeros((1, hidden), jnp.float32)
    return (w1, b1, g1, be1, w2, b2, g2, be2, w3, b3, g3, be3, w4, b4)


if __name__ == "__main__":
    B, EMB_DIMS, N_POINTS = 2, 32, 16
    TEMP_FACTOR = 100.0

    key = jax.random.PRNGKey(0)
    k_src, k_tgt, k_par = jax.random.split(key, 3)
    src = jax.random.normal(k_src, (B, EMB_DIMS, N_POINTS), jnp.float32)
    tgt = jax.random.normal(k_tgt, (B, EMB_DIMS, N_POINTS), jnp.float32)
    params = init_params(k_par, EMB_DIMS)

    temperature, residual = temperature_net_forward(src, tgt, params, TEMP_FACTOR)
    jax.block_until_ready((temperature, residual))

    assert temperature.shape == (B, 1)
    assert residual.shape == (B, EMB_DIMS)
    assert bool(jnp.all(jnp.isfinite(temperature)))
    assert bool(jnp.all(jnp.isfinite(residual)))
    assert bool(jnp.all(temperature >= 1.0 / TEMP_FACTOR))
    assert bool(jnp.all(temperature <= TEMP_FACTOR))
    print("KERNEL_OK")
</pallas_src>

<mosaic_0001>
module attributes {stable_mosaic.version = 11 : i64} {
  func.func @_temperature_kernel(%arg0: memref<3xf32, #tpu.memory_space<smem>>, %arg1: memref<2x32x16xf32, #tpu.memory_space<vmem>>, %arg2: memref<2x32x16xf32, #tpu.memory_space<vmem>>, %arg3: memref<32x128xbf16, #tpu.memory_space<vmem>>, %arg4: memref<2x128x128xbf16, #tpu.memory_space<vmem>>, %arg5: memref<10x128xf32, #tpu.memory_space<vmem>>, %arg6: memref<2x1xf32, #tpu.memory_space<vmem>>, %arg7: memref<2x32xf32, #tpu.memory_space<vmem>>) attributes {dimension_semantics = [], scalar_prefetch = 0 : i64, scratch_operands = 0 : i64, tpu.core_type = #tpu.core_type<tc>} {
    %c0 = arith.constant 0 : index
    %c0_0 = arith.constant 0 : index
    %c0_1 = arith.constant 0 : index
    %0 = vector.load %arg1[%c0, %c0_0, %c0_1] : memref<2x32x16xf32, #tpu.memory_space<vmem>>, vector<2x32x16xf32>
    %cst = arith.constant dense<0.000000e+00> : vector<2x32xf32>
    %1 = vector.multi_reduction <add>, %0, %cst [2] : vector<2x32x16xf32> to vector<2x32xf32>
    %cst_2 = arith.constant 6.250000e-02 : f32
    %2 = vector.broadcast %cst_2 : f32 to vector<2x32xf32>
    %3 = arith.mulf %1, %2 : vector<2x32xf32>
    %c0_3 = arith.constant 0 : index
    %c0_4 = arith.constant 0 : index
    %c0_5 = arith.constant 0 : index
    %4 = vector.load %arg2[%c0_3, %c0_4, %c0_5] : memref<2x32x16xf32, #tpu.memory_space<vmem>>, vector<2x32x16xf32>
    %cst_6 = arith.constant dense<0.000000e+00> : vector<2x32xf32>
    %5 = vector.multi_reduction <add>, %4, %cst_6 [2] : vector<2x32x16xf32> to vector<2x32xf32>
    %cst_7 = arith.constant 6.250000e-02 : f32
    %6 = vector.broadcast %cst_7 : f32 to vector<2x32xf32>
    %7 = arith.mulf %5, %6 : vector<2x32xf32>
    %8 = arith.subf %3, %7 : vector<2x32xf32>
    %9 = math.absf %8 : vector<2x32xf32>
    %c0_8 = arith.constant 0 : index
    %c0_9 = arith.constant 0 : index
    %10 = vector.load %arg7[%c0_8, %c0_9] : memref<2x32xf32, #tpu.memory_space<vmem>>, vector<2x32xf32>
    tpu.vector_store %arg7[%c0_8, %c0_9], %9 {strides = array<i32>} : memref<2x32xf32, #tpu.memory_space<vmem>>, vector<2x32xf32>,
    %11 = arith.truncf %9 : vector<2x32xf32> to vector<2x32xbf16>
    %c0_10 = arith.constant 0 : index
    %c0_11 = arith.constant 0 : index
    %12 = vector.load %arg3[%c0_10, %c0_11] : memref<32x128xbf16, #tpu.memory_space<vmem>>, vector<32x128xbf16>
    %cst_12 = arith.constant dense<0.000000e+00> : vector<2x128xf32>
    %13 = tpu.matmul %11, %12, %cst_12 {dimension_numbers = #tpu.dot_dimension_numbers<[1], [0], [0], [1], [0, 0, 1, 1], [], []>} : vector<2x32xbf16>, vector<32x128xbf16>, vector<2x128xf32> -> vector<2x128xf32>
    %c0_13 = arith.constant 0 : index
    %c0_14 = arith.constant 0 : index
    %14 = vector.load %arg5[%c0_13, %c0_14] : memref<10x128xf32, #tpu.memory_space<vmem>>, vector<1x128xf32>
    %15 = vector.broadcast %14 : vector<1x128xf32> to vector<2x128xf32>
    %16 = arith.addf %13, %15 : vector<2x128xf32>
    %c1 = arith.constant 1 : index
    %c0_15 = arith.constant 0 : index
    %17 = vector.load %arg5[%c1, %c0_15] : memref<10x128xf32, #tpu.memory_space<vmem>>, vector<1x128xf32>
    %c2 = arith.constant 2 : index
    %c0_16 = arith.constant 0 : index
    %18 = vector.load %arg5[%c2, %c0_16] : memref<10x128xf32, #tpu.memory_space<vmem>>, vector<1x128xf32>
    %cst_17 = arith.constant dense<0.000000e+00> : vector<128xf32>
    %19 = vector.multi_reduction <add>, %16, %cst_17 [0] : vector<2x128xf32> to vector<128xf32>
    %20 = vector.shape_cast %19 : vector<128xf32> to vector<1x128xf32>
    %cst_18 = arith.constant 2.000000e+00 : f32
    %21 = vector.broadcast %cst_18 : f32 to vector<1x128xf32>
    %22 = arith.divf %20, %21 : vector<1x128xf32>
    %23 = vector.broadcast %22 : vector<1x128xf32> to vector<2x128xf32>
    %24 = arith.subf %16, %23 : vector<2x128xf32>
    %25 = arith.mulf %24, %24 : vector<2x128xf32>
    %cst_19 = arith.constant dense<0.000000e+00> : vector<128xf32>
    %26 = vector.multi_reduction <add>, %25, %cst_19 [0] : vector<2x128xf32> to vector<128xf32>
    %27 = vector.shape_cast %26 : vector<128xf32> to vector<1x128xf32>
    %cst_20 = arith.constant 2.000000e+00 : f32
    %28 = vector.broadcast %cst_20 : f32 to vector<1x128xf32>
    %29 = arith.divf %27, %28 : vector<1x128xf32>
    %30 = vector.broadcast %22 : vector<1x128xf32> to vector<2x128xf32>
    %31 = arith.subf %16, %30 : vector<2x128xf32>
    %cst_21 = arith.constant 9.99999974E-6 : f32
    %32 = vector.broadcast %cst_21 : f32 to vector<1x128xf32>
    %33 = arith.addf %29, %32 : vector<1x128xf32>
    %34 = math.rsqrt %33 : vector<1x128xf32>
    %35 = vector.broadcast %34 : vector<1x128xf32> to vector<2x128xf32>
    %36 = arith.mulf %31, %35 : vector<2x128xf32>
    %37 = vector.broadcast %17 : vector<1x128xf32> to vector<2x128xf32>
    %38 = arith.mulf %36, %37 : vector<2x128xf32>
    %39 = vector.broadcast %18 : vector<1x128xf32> to vector<2x128xf32>
    %40 = arith.addf %38, %39 : vector<2x128xf32>
    %cst_22 = arith.constant 0.000000e+00 : f32
    %41 = vector.broadcast %cst_22 : f32 to vector<2x128xf32>
    %42 = arith.maximumf %40, %41 : vector<2x128xf32>
    %43 = arith.truncf %42 : vector<2x128xf32> to vector<2x128xbf16>
    %c0_23 = arith.constant 0 : index
    %c0_24 = arith.constant 0 : index
    %c0_25 = arith.constant 0 : index
    %44 = vector.load %arg4[%c0_23, %c0_24, %c0_25] : memref<2x128x128xbf16, #tpu.memory_space<vmem>>, vector<1x128x128xbf16>
    %45 = vector.shape_cast %44 : vector<1x128x128xbf16> to vector<128x128xbf16>
    %cst_26 = arith.constant dense<0.000000e+00> : vector<2x128xf32>
    %46 = tpu.matmul %43, %45, %cst_26 {dimension_numbers = #tpu.dot_dimension_numbers<[1], [0], [0], [1], [0, 0, 1, 1], [], []>} : vector<2x128xbf16>, vector<128x128xbf16>, vector<2x128xf32> -> vector<2x128xf32>
    %c3 = arith.constant 3 : index
    %c0_27 = arith.constant 0 : index
    %47 = vector.load %arg5[%c3, %c0_27] : memref<10x128xf32, #tpu.memory_space<vmem>>, vector<1x128xf32>
    %48 = vector.broadcast %47 : vector<1x128xf32> to vector<2x128xf32>
    %49 = arith.addf %46, %48 : vector<2x128xf32>
    %c4 = arith.constant 4 : index
    %c0_28 = arith.constant 0 : index
    %50 = vector.load %arg5[%c4, %c0_28] : memref<10x128xf32, #tpu.memory_space<vmem>>, vector<1x128xf32>
    %c5 = arith.constant 5 : index
    %c0_29 = arith.constant 0 : index
    %51 = vector.load %arg5[%c5, %c0_29] : memref<10x128xf32, #tpu.memory_space<vmem>>, vector<1x128xf32>
    %cst_30 = arith.constant dense<0.000000e+00> : vector<128xf32>
    %52 = vector.multi_reduction <add>, %49, %cst_30 [0] : vector<2x128xf32> to vector<128xf32>
    %53 = vector.shape_cast %52 : vector<128xf32> to vector<1x128xf32>
    %cst_31 = arith.constant 2.000000e+00 : f32
    %54 = vector.broadcast %cst_31 : f32 to vector<1x128xf32>
    %55 = arith.divf %53, %54 : vector<1x128xf32>
    %56 = vector.broadcast %55 : vector<1x128xf32> to vector<2x128xf32>
    %57 = arith.subf %49, %56 : vector<2x128xf32>
    %58 = arith.mulf %57, %57 : vector<2x128xf32>
    %cst_32 = arith.constant dense<0.000000e+00> : vector<128xf32>
    %59 = vector.multi_reduction <add>, %58, %cst_32 [0] : vector<2x128xf32> to vector<128xf32>
    %60 = vector.shape_cast %59 : vector<128xf32> to vector<1x128xf32>
    %cst_33 = arith.constant 2.000000e+00 : f32
    %61 = vector.broadcast %cst_33 : f32 to vector<1x128xf32>
    %62 = arith.divf %60, %61 : vector<1x128xf32>
    %63 = vector.broadcast %55 : vector<1x128xf32> to vector<2x128xf32>
    %64 = arith.subf %49, %63 : vector<2x128xf32>
    %cst_34 = arith.constant 9.99999974E-6 : f32
    %65 = vector.broadcast %cst_34 : f32 to vector<1x128xf32>
    %66 = arith.addf %62, %65 : vector<1x128xf32>
    %67 = math.rsqrt %66 : vector<1x128xf32>
    %68 = vector.broadcast %67 : vector<1x128xf32> to vector<2x128xf32>
    %69 = arith.mulf %64, %68 : vector<2x128xf32>
    %70 = vector.broadcast %50 : vector<1x128xf32> to vector<2x128xf32>
    %71 = arith.mulf %69, %70 : vector<2x128xf32>
    %72 = vector.broadcast %51 : vector<1x128xf32> to vector<2x128xf32>
    %73 = arith.addf %71, %72 : vector<2x128xf32>
    %cst_35 = arith.constant 0.000000e+00 : f32
    %74 = vector.broadcast %cst_35 : f32 to vector<2x128xf32>
    %75 = arith.maximumf %73, %74 : vector<2x128xf32>
    %76 = arith.truncf %75 : vector<2x128xf32> to vector<2x128xbf16>
    %c1_36 = arith.constant 1 : index
    %c0_37 = arith.constant 0 : index
    %c0_38 = arith.constant 0 : index
    %77 = vector.load %arg4[%c1_36, %c0_37, %c0_38] : memref<2x128x128xbf16, #tpu.memory_space<vmem>>, vector<1x128x128xbf16>
    %78 = vector.shape_cast %77 : vector<1x128x128xbf16> to vector<128x128xbf16>
    %cst_39 = arith.constant dense<0.000000e+00> : vector<2x128xf32>
    %79 = tpu.matmul %76, %78, %cst_39 {dimension_numbers = #tpu.dot_dimension_numbers<[1], [0], [0], [1], [0, 0, 1, 1], [], []>} : vector<2x128xbf16>, vector<128x128xbf16>, vector<2x128xf32> -> vector<2x128xf32>
    %c6 = arith.constant 6 : index
    %c0_40 = arith.constant 0 : index
    %80 = vector.load %arg5[%c6, %c0_40] : memref<10x128xf32, #tpu.memory_space<vmem>>, vector<1x128xf32>
    %81 = vector.broadcast %80 : vector<1x128xf32> to vector<2x128xf32>
    %82 = arith.addf %79, %81 : vector<2x128xf32>
    %c7 = arith.constant 7 : index
    %c0_41 = arith.constant 0 : index
    %83 = vector.load %arg5[%c7, %c0_41] : memref<10x128xf32, #tpu.memory_space<vmem>>, vector<1x128xf32>
    %c8 = arith.constant 8 : index
    %c0_42 = arith.constant 0 : index
    %84 = vector.load %arg5[%c8, %c0_42] : memref<10x128xf32, #tpu.memory_space<vmem>>, vector<1x128xf32>
    %cst_43 = arith.constant dense<0.000000e+00> : vector<128xf32>
    %85 = vector.multi_reduction <add>, %82, %cst_43 [0] : vector<2x128xf32> to vector<128xf32>
    %86 = vector.shape_cast %85 : vector<128xf32> to vector<1x128xf32>
    %cst_44 = arith.constant 2.000000e+00 : f32
    %87 = vector.broadcast %cst_44 : f32 to vector<1x128xf32>
    %88 = arith.divf %86, %87 : vector<1x128xf32>
    %89 = vector.broadcast %88 : vector<1x128xf32> to vector<2x128xf32>
    %90 = arith.subf %82, %89 : vector<2x128xf32>
    %91 = arith.mulf %90, %90 : vector<2x128xf32>
    %cst_45 = arith.constant dense<0.000000e+00> : vector<128xf32>
    %92 = vector.multi_reduction <add>, %91, %cst_45 [0] : vector<2x128xf32> to vector<128xf32>
    %93 = vector.shape_cast %92 : vector<128xf32> to vector<1x128xf32>
    %cst_46 = arith.constant 2.000000e+00 : f32
    %94 = vector.broadcast %cst_46 : f32 to vector<1x128xf32>
    %95 = arith.divf %93, %94 : vector<1x128xf32>
    %96 = vector.broadcast %88 : vector<1x128xf32> to vector<2x128xf32>
    %97 = arith.subf %82, %96 : vector<2x128xf32>
    %cst_47 = arith.constant 9.99999974E-6 : f32
    %98 = vector.broadcast %cst_47 : f32 to vector<1x128xf32>
    %99 = arith.addf %95, %98 : vector<1x128xf32>
    %100 = math.rsqrt %99 : vector<1x128xf32>
    %101 = vector.broadcast %100 : vector<1x128xf32> to vector<2x128xf32>
    %102 = arith.mulf %97, %101 : vector<2x128xf32>
    %103 = vector.broadcast %83 : vector<1x128xf32> to vector<2x128xf32>
    %104 = arith.mulf %102, %103 : vector<2x128xf32>
    %105 = vector.broadcast %84 : vector<1x128xf32> to vector<2x128xf32>
    %106 = arith.addf %104, %105 : vector<2x128xf32>
    %cst_48 = arith.constant 0.000000e+00 : f32
    %107 = vector.broadcast %cst_48 : f32 to vector<2x128xf32>
    %108 = arith.maximumf %106, %107 : vector<2x128xf32>
    %c9 = arith.constant 9 : index
    %c0_49 = arith.constant 0 : index
    %109 = vector.load %arg5[%c9, %c0_49] : memref<10x128xf32, #tpu.memory_space<vmem>>, vector<1x128xf32>
    %110 = vector.broadcast %109 : vector<1x128xf32> to vector<2x128xf32>
    %111 = arith.mulf %108, %110 : vector<2x128xf32>
    %cst_50 = arith.constant dense<0.000000e+00> : vector<2xf32>
    %112 = vector.multi_reduction <add>, %111, %cst_50 [1] : vector<2x128xf32> to vector<2xf32>
    %113 = vector.shape_cast %112 : vector<2xf32> to vector<2x1xf32>
    %c2_51 = arith.constant 2 : index
    %114 = memref.load %arg0[%c2_51] : memref<3xf32, #tpu.memory_space<smem>>
    %115 = vector.broadcast %114 : f32 to vector<2x1xf32>
    %116 = arith.addf %113, %115 : vector<2x1xf32>
    %cst_52 = arith.constant 0.000000e+00 : f32
    %117 = vector.broadcast %cst_52 : f32 to vector<2x1xf32>
    %118 = arith.maximumf %116, %117 : vector<2x1xf32>
    %c0_53 = arith.constant 0 : index
    %119 = memref.load %arg0[%c0_53] : memref<3xf32, #tpu.memory_space<smem>>
    %c1_54 = arith.constant 1 : index
    %120 = memref.load %arg0[%c1_54] : memref<3xf32, #tpu.memory_space<smem>>
    %121 = vector.broadcast %119 : f32 to vector<2x1xf32>
    %122 = arith.maximumf %121, %118 : vector<2x1xf32>
    %123 = vector.broadcast %120 : f32 to vector<2x1xf32>
    %124 = arith.minimumf %123, %122 : vector<2x1xf32>
    %c0_55 = arith.constant 0 : index
    %c0_56 = arith.constant 0 : index
    %125 = vector.load %arg6[%c0_55, %c0_56] : memref<2x1xf32, #tpu.memory_space<vmem>>, vector<2x1xf32>
    tpu.vector_store %arg6[%c0_55, %c0_56], %124 {strides = array<i32>} : memref<2x1xf32, #tpu.memory_space<vmem>>, vector<2x1xf32>,
    return
  }
}

</mosaic_0001>

<bundles_post_ra>
// kernel: tpu_custom_call.1
= control target key start
LH: loop header
LB: loop body
LE: loop exit
PB: predicated region body
PF: predicated region fallthrough
CT: control target
= control target key end

     0   :  { %13 = vsyncpa [#allocation4], 0  ;;  %s1108_s0 = inlined_call_operand.vmem [shape: f32[3], index: 0, kind: input, shape index: {}]   ;;  %s1109_s1 = inlined_call_operand.vmem [shape: f32[2,32,16], index: 1, kind: input, shape index: {}]   ;;  %s1110_s2 = inlined_call_operand.vmem [shape: f32[2,32,16], index: 2, kind: input, shape index: {}]   ;;  %s1111_s3 = inlined_call_operand.vmem [shape: bf16[32,128], index: 3, kind: input, shape index: {}]   ;;  %s1112_s4 = inlined_call_operand.vmem [shape: bf16[2,128,128], index: 4, kind: input, shape index: {}]   ;;  %s1113_s5 = inlined_call_operand.vmem [shape: f32[10,128], index: 5, kind: input, shape index: {}]   ;;  %s1114_s6 = inlined_call_operand.vmem [shape: f32[2,1], index: 6, kind: output, shape index: {0}]   ;;  %s1115_s7 = inlined_call_operand.hbm [shape: f32[2,32], index: 7, kind: output, shape index: {1}]  }
   0x1   :  { %14 = vsyncpa [#allocation3], 0  ;;  %s21_s26 = sshll.u32 %s1108_s0, 4  ;;  %s22_s26 = int_to_ptr.vmem [resolvable:$true] %s21_s26 }
   0x2   :  { %s826_s27 = scalar_lea.vmem %s22_s26, 16  ;;  %p831_p1 = scmp.lt.s32.totalorder %s22_s26, %s22_s26 }
   0x3   :  { %p827_p0 = scmp.ne.s32.totalorder %s22_s26, %s826_s27  ;;  %p832_p2 = scmp.lt.s32.totalorder %s826_s27, %s826_s27 }
   0x5   :  { %p833_p3 = por %p832_p2, %p831_p1 }
   0x7   :  { %p834_p4 = pnand %p833_p3, %p827_p0 }
   0x9   :  { %837 = shalt.err (!%p834_p4)
}
   0xa   :  { %s862_s28 = smov [#allocation2]  }
   0xb   :  { %24 = dma.vmem_to_smem %s22_s26, 16, %s862_s28, [#allocation4]  }
   0xc   :  { %858 = dma.done.wait [#allocation4], 16  }
   0xd   :  { %859 = vsyncadd [#allocation4], 4294967280 }
   0xe   :  { %38 = sfence }
   0xf   :  { %v44_v0 = vld [vmem:[%s1109_s1 + $0x20] sm:$0xff]  ;;  %vm48_vm0 = vcmask 130048   ;;  %v45_v2 = vld [vmem:[%s1109_s1 + $0x28] sm:$0xff]  ;;  %v43_v12 = vld [vmem:[%s1109_s1 + $0x18] sm:$0xff]  ;;  %v863_v33 = vmov 0.0   ;;  %vm864_vm1 = vmmov 0   ;;  %v145_v43 = vlaneseq }
  0x10   :  { %v40_v1 = vld [vmem:[%s1109_s1] sm:$0xff]  ;;  %v61_v3 = vsel %vm48_vm0, %v44_v0, 0.0  ;;  %v41_v5 = vld [vmem:[%s1109_s1 + $0x8] sm:$0xff]  ;;  %v64_v10 = vsel %vm48_vm0, %v45_v2, 0.0  ;;  %v42_v13 = vld [vmem:[%s1109_s1 + $0x10] sm:$0xff]  ;;  %v58_v18 = vsel %vm48_vm0, %v43_v12, 0.0  ;;  %750 = vmatprep.subr.bf16.mxu0 %v863_v33  ;;  %758 = vmatprep.subr.bf16.mxu1 %v863_v33 }
  0x11   :  { %v49_v4 = vsel %vm48_vm0, %v40_v1, 0.0  ;;  %v82_v6 = vld [vmem:[%s1110_s2 + $0x8] sm:$0xff]  ;;  %62 = vadd.xlane.f32.xlu1 %v61_v3  ;;  %v81_v7 = vld [vmem:[%s1110_s2] sm:$0xff]  ;;  %v52_v11 = vsel %vm48_vm0, %v41_v5, 0.0  ;;  %v55_v19 = vsel %vm48_vm0, %v42_v13, 0.0  ;;  %v47_v20 = vld [vmem:[%s1109_s1 + $0x38] sm:$0xff]  ;;  %754 = vmatprep.mubr.msk.bf16.mxu0 %vm864_vm1, %v863_v33 }
  0x12   :  { %50 = vadd.xlane.f32.xlu0 %v49_v4  ;;  %v86_v8 = vld [vmem:[%s1110_s2 + $0x28] sm:$0xff]  ;;  %v85_v9 = vld [vmem:[%s1110_s2 + $0x20] sm:$0xff]  ;;  %v92_v14 = vsel %vm48_vm0, %v82_v6, 0.0  ;;  %v89_v15 = vsel %vm48_vm0, %v81_v7, 0.0  ;;  %v46_v21 = vld [vmem:[%s1109_s1 + $0x30] sm:$0xff]  ;;  %v70_v22 = vsel %vm48_vm0, %v47_v20, 0.0  ;;  %774 = vmatprep.mubr.msk.bf16.mxu1 %vm864_vm1, %v863_v33 }
  0x13   :  { %v104_v16 = vsel %vm48_vm0, %v86_v8, 0.0  ;;  %v101_v17 = vsel %vm48_vm0, %v85_v9, 0.0  ;;  %v67_v23 = vsel %vm48_vm0, %v46_v21, 0.0  ;;  %v84_v24 = vld [vmem:[%s1110_s2 + $0x18] sm:$0xff]  ;;  %v83_v25 = vld [vmem:[%s1110_s2 + $0x10] sm:$0xff]  ;;  %v802_v32 = vld [vmem:[%s1111_s3 + $0x8] sm:$0xff]  }
  0x14   :  { %v98_v26 = vsel %vm48_vm0, %v84_v24, 0.0  ;;  %v95_v27 = vsel %vm48_vm0, %v83_v25, 0.0  ;;  %v88_v28 = vld [vmem:[%s1110_s2 + $0x38] sm:$0xff]  ;;  %v87_v29 = vld [vmem:[%s1110_s2 + $0x30] sm:$0xff]  ;;  %751 = vmatpush3.bf16.msra.mxu0 %v802_v32  ;;  %v803_v34 = vld [vmem:[%s1111_s3] sm:$0xff]   ;;  %v146_v52 = vand.u32 127, %v145_v43 }
  0x15   :  { %65 = vadd.xlane.f32.xlu1 %v64_v10  ;;  %v110_v30 = vsel %vm48_vm0, %v88_v28, 0.0  ;;  %v107_v31 = vsel %vm48_vm0, %v87_v29, 0.0  ;;  %752 = vmatprep.subr.bf16.mxu0 %v863_v33  ;;  %v148_v61 = vshrl.u32 %v145_v43, 7  ;;  %vm156_vm2 = vcmask 130112   ;;  %s865_s13 = smov [#allocation5]  }
  0x16   :  { %53 = vadd.xlane.f32.xlu0 %v52_v11  ;;  %v151_v62 = vadd.s32 4294967288, %v146_v52  ;;  %v165_v3 = vadd.s32 4294967272, %v146_v52  ;;  %v158_v5 = vadd.s32 4294967280, %v146_v52  ;;  %vm163_vm3 = vcmask 195712   ;;  %s671_s14 = sshll.u32 %s865_s13, 4  ;;  %s672_s14 = int_to_ptr.vmem [resolvable:$true] %s671_s14 }
  0x17   :  { %v149_v12 = vsub.s32 %v146_v52, %v148_v61  ;;  %vm170_vm4 = vcmask 261312   ;;  %vm191_vm5 = vcmask 1041409   ;;  %vm194_vm6 = vcmask 254976   ;;  %s838_s2 = scalar_lea.vmem %s672_s14, 32  ;;  %p843_p6 = scmp.lt.s32.totalorder %s672_s14, %s672_s14 }
  0x18   :  { %753 = vmatpush3.bf16.msra.mxu0 %v803_v34  ;;  %v154_v11 = vsub.s32 %v151_v62, %v148_v61  ;;  %vm273_vm7 = vcmask 261120   ;;  %vm319_vm8 = vcmask 1041408   ;;  %p839_p5 = scmp.ne.s32.totalorder %s672_s14, %s838_s2  ;;  %p844_p7 = scmp.lt.s32.totalorder %s838_s2, %s838_s2 }
  0x19   :  { %93 = vadd.xlane.f32.xlu1 %v92_v14  ;;  %778 = vmatprep.subr.bf16.mxu0 %v863_v33 }
  0x1a   :  { %90 = vadd.xlane.f32.xlu0 %v89_v15  ;;  %p845_p8 = por %p844_p7, %p843_p6 }
  0x1c   :  { %p846_p9 = pnand %p845_p8, %p839_p5 }
  0x1d   :  { %105 = vadd.xlane.f32.xlu1 %v104_v16 }
  0x1e   :  { %102 = vadd.xlane.f32.xlu0 %v101_v17 }
  0x21   :  { %59 = vadd.xlane.f32.xlu1 %v58_v18  ;;  %v168_v18 = vsub.s32 %v165_v3, %v148_v61 }
  0x22   :  { %56 = vadd.xlane.f32.xlu0 %v55_v19  ;;  %v161_v19 = vsub.s32 %v158_v5, %v148_v61 }
  0x25   :  { %71 = vadd.xlane.f32.xlu1 %v70_v22 }
  0x26   :  { %68 = vadd.xlane.f32.xlu0 %v67_v23 }
  0x29   :  { %99 = vadd.xlane.f32.xlu1 %v98_v26 }
  0x2a   :  { %96 = vadd.xlane.f32.xlu0 %v95_v27 }
  0x2d   :  { %111 = vadd.xlane.f32.xlu1 %v110_v30 }
  0x2e   :  { %108 = vadd.xlane.f32.xlu0 %v107_v31 }
  0x9a   :  { %v63_v35 = vpop.xlane.xlu1 %62 }
  0x9b   :  { %v51_v36 = vpop.xlane.xlu0 %50  ;;  %v77_v53 = vmul.f32 0.0625, %v63_v35 }
  0x9c   :  { %v73_v46 = vmul.f32 0.0625, %v51_v36 }
  0x9e   :  { %v66_v37 = vpop.xlane.xlu1 %65 }
  0x9f   :  { %v54_v38 = vpop.xlane.xlu0 %53  ;;  %v78_v54 = vmul.f32 0.0625, %v66_v37 }
  0xa0   :  { %v74_v47 = vmul.f32 0.0625, %v54_v38 }
  0xa2   :  { %v94_v39 = vpop.xlane.xlu1 %93 }
  0xa3   :  { %v91_v40 = vpop.xlane.xlu0 %90  ;;  %v114_v44 = vmul.f32 0.0625, %v94_v39 }
  0xa4   :  { %v113_v45 = vmul.f32 0.0625, %v91_v40 }
  0xa5   :  { %v122_v55 = vsub.f32 %v74_v47, %v114_v44 }
  0xa6   :  { %v106_v41 = vpop.xlane.xlu1 %105  ;;  %v121_v56 = vsub.f32 %v73_v46, %v113_v45 }
  0xa7   :  { %v103_v42 = vpop.xlane.xlu0 %102  ;;  %v118_v48 = vmul.f32 0.0625, %v106_v41  ;;  %v130_v63 = vand.u32 2147483647, %v122_v55 }
  0xa8   :  { %v117_v49 = vmul.f32 0.0625, %v103_v42  ;;  %v129_v0 = vand.u32 2147483647, %v121_v56 }
  0xa9   :  { %v126_v57 = vsub.f32 %v78_v54, %v118_v48  ;;  %v155_v26 = vrot.slane %v130_v63, %v154_v11 }
  0xaa   :  { %v60_v50 = vpop.xlane.xlu1 %59  ;;  %v125_v58 = vsub.f32 %v77_v53, %v117_v49  ;;  %v196_v13 = vpack.c.bf16 %v130_v63, %v129_v0  ;;  %v150_v27 = vrot.slane %v129_v0, %v149_v12 }
  0xab   :  { %v57_v51 = vpop.xlane.xlu0 %56  ;;  %v134_v1 = vand.u32 2147483647, %v126_v57  ;;  %v76_v7 = vmul.f32 0.0625, %v60_v50 }
  0xac   :  { %v133_v2 = vand.u32 2147483647, %v125_v58  ;;  %v75_v8 = vmul.f32 0.0625, %v57_v51  ;;  %v213_v28 = vunpack.c.l.b16 %v196_v13  ;;  %v214_v30 = vunpack.c.h.b16 %v196_v13  ;;  %v808_v13 = vld [vmem:[%s1112_s4 + $0x18] sm:$0xff]  }
  0xad   :  { %v179_v34 = vrot.slane %v134_v1, %v154_v11  ;;  %v157_v44 = vsel %vm156_vm2, %v155_v26, %v150_v27 }
  0xae   :  { %v72_v59 = vpop.xlane.xlu1 %71  ;;  %v198_v16 = vpack.c.bf16 %v134_v1, %v133_v2  ;;  %v175_v35 = vrot.slane %v133_v2, %v149_v12  ;;  %v224_v42 = vrot.slane %v213_v28, %v149_v12  ;;  %v228_v45 = vrot.slane %v214_v30, %v154_v11 }
  0xaf   :  { %v69_v60 = vpop.xlane.xlu0 %68  ;;  %v80_v17 = vmul.f32 0.0625, %v72_v59 }
  0xb0   :  { %v79_v29 = vmul.f32 0.0625, %v69_v60  ;;  %v217_v38 = vunpack.c.l.b16 %v198_v16  ;;  %v218_v39 = vunpack.c.h.b16 %v198_v16  ;;  %v180_v55 = vsel %vm156_vm2, %v179_v34, %v175_v35  ;;  %v811_v16 = vld [vmem:[%s1112_s4] sm:$0xff]  }
  0xb1   :  { %v229_v59 = vsel %vm156_vm2, %v228_v45, %v224_v42 }
  0xb2   :  { %v100_v4 = vpop.xlane.xlu1 %99  ;;  %v243_v53 = vrot.slane %v217_v38, %v149_v12  ;;  %v247_v54 = vrot.slane %v218_v39, %v154_v11  ;;  %v806_v11 = vld [vmem:[%s1112_s4 + $0x28] sm:$0xff]   ;;  %v807_v12 = vld [vmem:[%s1112_s4 + $0x20] sm:$0xff]  }
  0xb3   :  { %v97_v6 = vpop.xlane.xlu0 %96  ;;  %v116_v9 = vmul.f32 0.0625, %v100_v4 }
  0xb4   :  { %v115_v10 = vmul.f32 0.0625, %v97_v6  ;;  %v248_v3 = vsel %vm156_vm2, %v247_v54, %v243_v53  ;;  %v814_v53 = vld [vmem:[%s1112_s4 + $0x68] sm:$0xff]   ;;  %v815_v54 = vld [vmem:[%s1112_s4 + $0x60] sm:$0xff]  }
  0xb5   :  { %v124_v14 = vsub.f32 %v76_v7, %v116_v9  ;;  %v804_v9 = vld [vmem:[%s1112_s4 + $0x38] sm:$0xff]  }
  0xb6   :  { %v123_v15 = vsub.f32 %v75_v8, %v115_v10  ;;  %v112_v20 = vpop.xlane.xlu1 %111  ;;  %759 = vmatpush3.bf16.msra.mxu1 %v804_v9  ;;  %v805_v10 = vld [vmem:[%s1112_s4 + $0x30] sm:$0xff]  }
  0xb7   :  { %v109_v21 = vpop.xlane.xlu0 %108  ;;  %v132_v22 = vand.u32 2147483647, %v124_v14  ;;  %v120_v24 = vmul.f32 0.0625, %v112_v20  ;;  %760 = vmatprep.subr.bf16.mxu1 %v863_v33  ;;  %v809_v14 = vld [vmem:[%s1112_s4 + $0x10] sm:$0xff]  }
  0xb8   :  { %v131_v23 = vand.u32 2147483647, %v123_v15  ;;  %v119_v25 = vmul.f32 0.0625, %v109_v21  ;;  %v810_v15 = vld [vmem:[%s1112_s4 + $0x8] sm:$0xff]  }
  0xb9   :  { %v128_v32 = vsub.f32 %v80_v17, %v120_v24  ;;  %v169_v46 = vrot.slane %v132_v22, %v168_v18  ;;  %v682_v17 = vld [vmem:[%s1113_s5] ss:$0 sm:$0xff] }
  0xba   :  { %v197_v31 = vpack.c.bf16 %v132_v22, %v131_v23  ;;  %v162_v36 = vrot.slane %v131_v23, %v161_v19  ;;  %v127_v37 = vsub.f32 %v79_v29, %v119_v25  ;;  %761 = vmatpush3.bf16.msra.mxu1 %v805_v10 }
  0xbb   :  { %v136_v41 = vand.u32 2147483647, %v128_v32  ;;  %762 = vmatprep.subr.bf16.mxu1 %v863_v33 }
  0xbc   :  { %v215_v40 = vunpack.c.l.b16 %v197_v31  ;;  %v135_v43 = vand.u32 2147483647, %v127_v37  ;;  %v216_v47 = vunpack.c.h.b16 %v197_v31  ;;  %v164_v52 = vsel %vm163_vm3, %v162_v36, %v157_v44  ;;  %v686_v44 = vld [vmem:[%s1113_s5 + $0x1] ss:$0 sm:$0xff] }
  0xbd   :  { %v189_v48 = vrot.slane %v136_v41, %v168_v18  ;;  %v171_v61 = vsel %vm170_vm4, %v169_v46, %v164_v52  ;;  %v687_v46 = vld [vmem:[%s1113_s5 + $0x2] ss:$0 sm:$0xff]  ;;  %v813_v52 = vld [vmem:[%s1112_s4 + $0x70] sm:$0xff]  }
  0xbe   :  { %v233_v49 = vrot.slane %v215_v40, %v161_v19  ;;  %v184_v50 = vrot.slane %v135_v43, %v161_v19  ;;  %v199_v51 = vpack.c.bf16 %v136_v41, %v135_v43  ;;  %v238_v60 = vrot.slane %v216_v47, %v168_v18  ;;  %763 = vmatpush3.bf16.msra.mxu1 %v806_v11 }
  0xbf   :  { %764 = vmatprep.subr.bf16.mxu1 %v863_v33 }
  0xc0   :  { %v219_v56 = vunpack.c.l.b16 %v199_v51  ;;  %v220_v57 = vunpack.c.h.b16 %v199_v51  ;;  %v185_v58 = vsel %vm163_vm3, %v184_v50, %v180_v55  ;;  %v234_v1 = vsel %vm163_vm3, %v233_v49, %v229_v59  ;;  %v812_v51 = vld [vmem:[%s1112_s4 + $0x78] sm:$0xff]   ;;  %v688_v59 = vld [vmem:[%s1113_s5 + $0x3] ss:$0 sm:$0xff] }
  0xc1   :  { %v190_v62 = vsel %vm170_vm4, %v189_v48, %v185_v58  ;;  %v239_v5 = vsel %vm170_vm4, %v238_v60, %v234_v1  ;;  %v816_v55 = vld [vmem:[%s1112_s4 + $0x58] sm:$0xff]   ;;  %v819_v58 = vld [vmem:[%s1112_s4 + $0x40] sm:$0xff]  }
  0xc2   :  { %v252_v63 = vrot.slane %v219_v56, %v161_v19  ;;  %v257_v0 = vrot.slane %v220_v57, %v168_v18  ;;  %v192_v2 = vsel %vm191_vm5, %v190_v62, %v171_v61  ;;  %765 = vmatpush3.bf16.msra.mxu1 %v807_v12  ;;  %v817_v56 = vld [vmem:[%s1112_s4 + $0x50] sm:$0xff]   ;;  %v818_v57 = vld [vmem:[%s1112_s4 + $0x48] sm:$0xff]  }
  0xc3   :  { %195 = vst.msk [vmem:[#allocation5] sm:$0x3] %vm194_vm6, %v192_v2  ;;  %766 = vmatprep.subr.bf16.mxu1 %v863_v33 }
  0xc4   :  { %v253_v4 = vsel %vm163_vm3, %v252_v63, %v248_v3 }
  0xc5   :  { %v258_v6 = vsel %vm170_vm4, %v257_v0, %v253_v4 }
  0xc6   :  { %v259_v7 = vsel %vm191_vm5, %v258_v6, %v239_v5  ;;  %767 = vmatpush3.bf16.msra.mxu1 %v808_v13 }
  0xc7   :  { %v260_v8 = vpack.c.b16 %v259_v7, %v259_v7  ;;  %768 = vmatprep.subr.bf16.mxu1 %v863_v33 }
  0xc9   :  { %755 = vmatmul.mubr.msk.bf16.vlgmr.msra.gmra.mxu0 %vm273_vm7, %v260_v8 }
  0xca   :  { %794 = vmatprep.mubr.msk.bf16.mxu0 %vm864_vm1, %v863_v33  ;;  %769 = vmatpush3.bf16.msra.mxu1 %v809_v14 }
  0xcb   :  { %770 = vmatprep.subr.bf16.mxu1 %v863_v33  ;;  %779 = vmatpush3.bf16.msra.mxu0 %v812_v51 }
  0xcc   :  { %780 = vmatprep.subr.bf16.mxu0 %v863_v33 }
  0xce   :  { %771 = vmatpush3.bf16.msra.mxu1 %v810_v15 }
  0xcf   :  { %772 = vmatprep.subr.bf16.mxu1 %v863_v33  ;;  %781 = vmatpush3.bf16.msra.mxu0 %v813_v52 }
  0xd0   :  { %782 = vmatprep.subr.bf16.mxu0 %v863_v33 }
  0xd2   :  { %773 = vmatpush3.bf16.msra.mxu1 %v811_v16 }
  0xd3   :  { %783 = vmatpush3.bf16.msra.mxu0 %v814_v53 }
  0xd4   :  { %784 = vmatprep.subr.bf16.mxu0 %v863_v33 }
  0xd7   :  { %785 = vmatpush3.bf16.msra.mxu0 %v815_v54  ;;  %v724_v54 = vld [vmem:[%s1113_s5 + $0x7] ss:$0 sm:$0xff] }
  0xd8   :  { %786 = vmatprep.subr.bf16.mxu0 %v863_v33 }
  0xdb   :  { %787 = vmatpush3.bf16.msra.mxu0 %v816_v55 }
  0xdc   :  { %788 = vmatprep.subr.bf16.mxu0 %v863_v33 }
  0xdf   :  { %789 = vmatpush3.bf16.msra.mxu0 %v817_v56  ;;  %v725_v56 = vld [vmem:[%s1113_s5 + $0x8] ss:$0 sm:$0xff] }
  0xe0   :  { %790 = vmatprep.subr.bf16.mxu0 %v863_v33 }
  0xe3   :  { %791 = vmatpush3.bf16.msra.mxu0 %v818_v57 }
  0xe4   :  { %792 = vmatprep.subr.bf16.mxu0 %v863_v33 }
  0xe7   :  { %793 = vmatpush3.bf16.msra.mxu0 %v819_v58 }
 0x189   :  { %v311_v18 = vpop.f32.mrf.mxu0 }
 0x18a   :  { %v312_v19 = vadd.f32 %v682_v17, %v311_v18 }
 0x18b   :  { %v756_v20 = vpop.f32.mrf.mxu0 }
 0x18c   :  { %v320_v21 = vsel %vm319_vm8, %v312_v19, 0.0  ;;  %v697_v20 = vld [vmem:[%s1113_s5 + $0x4] ss:$0 sm:$0xff] }
 0x18d   :  { %v321_v22 = vrot.slane %v320_v21, 4  ;;  %v314_v23 = vpop.f32.mrf.mxu0 }
 0x18f   :  { %v322_v24 = vadd.f32 %v321_v22, %v320_v21  ;;  %v757_v25 = vpop.f32.mrf.mxu0  ;;  %v698_v22 = vld [vmem:[%s1113_s5 + $0x5] ss:$0 sm:$0xff] }
 0x191   :  { %v323_v26 = vrot.slane %v322_v24, 2 }
 0x193   :  { %v324_v27 = vadd.f32 %v323_v26, %v322_v24 }
 0x195   :  { %v325_v28 = vrot.slane %v324_v27, 1 }
 0x197   :  { %v326_v29 = vadd.f32 %v325_v28, %v324_v27  ;;  %v715_v27 = vld [vmem:[%s1113_s5 + $0x6] ss:$0 sm:$0xff] }
 0x199   :  { %v328_v30 = vmul.f32 0.5, %v326_v29 }
 0x19b   :  { %v329_v31 = vsub.f32 %v312_v19, %v328_v30 }
 0x19d   :  { %v330_v32 = vmul.f32 %v329_v31, %v329_v31 }
 0x19f   :  { %v331_v34 = vsel %vm319_vm8, %v330_v32, 0.0 }
 0x1a0   :  { %v332_v35 = vrot.slane %v331_v34, 4 }
 0x1a2   :  { %v333_v36 = vadd.f32 %v332_v35, %v331_v34 }
 0x1a4   :  { %v334_v37 = vrot.slane %v333_v36, 2 }
 0x1a6   :  { %v335_v38 = vadd.f32 %v334_v37, %v333_v36 }
 0x1a8   :  { %v336_v39 = vrot.slane %v335_v38, 1 }
 0x1aa   :  { %v337_v40 = vadd.f32 %v336_v39, %v335_v38 }
 0x1ac   :  { %v338_v41 = vmul.f32 0.5, %v337_v40 }
 0x1ae   :  { %v339_v42 = vadd.f32 1e-05, %v338_v41 }
 0x1b0   :  { %820 = vrsqrt.f32 %v339_v42 }
 0x1bd   :  { %v821_v43 = vpop.eup %820 }
 0x1be   :  { %v341_v45 = vmul.f32 %v821_v43, %v329_v31 }
 0x1c0   :  { %v346_v47 = vmul.f32 %v686_v44, %v341_v45 }
 0x1c2   :  { %v351_v48 = vadd.f32 %v687_v46, %v346_v47 }
 0x1c4   :  { %v352_v49 = vmax.f32 %v351_v48, 0.0 }
 0x1c6   :  { %v353_v50 = vpack.c.bf16 %v352_v49, %v352_v49 }
 0x1c8   :  { %775 = vmatmul.mubr.bf16.vlgmr.msra.gmra.mxu1 %v353_v50 }
 0x288   :  { %v457_v60 = vpop.f32.mrf.mxu1 }
 0x289   :  { %v458_v61 = vadd.f32 %v688_v59, %v457_v60  ;;  %v726_v59 = vld [vmem:[%s1113_s5 + $0x9] ss:$0 sm:$0xff] }
 0x28a   :  { %v776_v62 = vpop.f32.mrf.mxu1 }
 0x28b   :  { %v465_v63 = vsel %vm319_vm8, %v458_v61, 0.0 }
 0x28c   :  { %v466_v0 = vrot.slane %v465_v63, 4  ;;  %v460_v1 = vpop.f32.mrf.mxu1 }
 0x28e   :  { %v467_v2 = vadd.f32 %v466_v0, %v465_v63  ;;  %v777_v3 = vpop.f32.mrf.mxu1 }
 0x290   :  { %v468_v4 = vrot.slane %v467_v2, 2 }
 0x292   :  { %v469_v5 = vadd.f32 %v468_v4, %v467_v2 }
 0x294   :  { %v470_v6 = vrot.slane %v469_v5, 1 }
 0x296   :  { %v471_v7 = vadd.f32 %v470_v6, %v469_v5 }
 0x298   :  { %v472_v8 = vmul.f32 0.5, %v471_v7 }
 0x29a   :  { %v473_v33 = vsub.f32 %v458_v61, %v472_v8 }
 0x29c   :  { %v474_v9 = vmul.f32 %v473_v33, %v473_v33 }
 0x29e   :  { %v475_v10 = vsel %vm319_vm8, %v474_v9, 0.0 }
 0x29f   :  { %v476_v11 = vrot.slane %v475_v10, 4 }
 0x2a1   :  { %v477_v12 = vadd.f32 %v476_v11, %v475_v10 }
 0x2a3   :  { %v478_v13 = vrot.slane %v477_v12, 2 }
 0x2a5   :  { %v479_v14 = vadd.f32 %v478_v13, %v477_v12 }
 0x2a7   :  { %v480_v15 = vrot.slane %v479_v14, 1 }
 0x2a9   :  { %v481_v16 = vadd.f32 %v480_v15, %v479_v14 }
 0x2ab   :  { %v482_v17 = vmul.f32 0.5, %v481_v16 }
 0x2ad   :  { %v483_v18 = vadd.f32 1e-05, %v482_v17 }
 0x2af   :  { %822 = vrsqrt.f32 %v483_v18 }
 0x2bc   :  { %v823_v19 = vpop.eup %822 }
 0x2bd   :  { %v485_v21 = vmul.f32 %v823_v19, %v473_v33 }
 0x2bf   :  { %v490_v23 = vmul.f32 %v697_v20, %v485_v21 }
 0x2c1   :  { %v495_v24 = vadd.f32 %v698_v22, %v490_v23 }
 0x2c3   :  { %v496_v25 = vmax.f32 %v495_v24, 0.0 }
 0x2c5   :  { %v497_v26 = vpack.c.bf16 %v496_v25, %v496_v25 }
 0x2c7   :  { %795 = vmatmul.mubr.bf16.vlgmr.msra.gmra.mxu0 %v497_v26 }
 0x387   :  { %v602_v28 = vpop.f32.mrf.mxu0 }
 0x388   :  { %v603_v29 = vadd.f32 %v715_v27, %v602_v28 }
 0x389   :  { %v796_v30 = vpop.f32.mrf.mxu0 }
 0x38a   :  { %v610_v31 = vsel %vm319_vm8, %v603_v29, 0.0 }
 0x38b   :  { %v611_v32 = vrot.slane %v610_v31, 4  ;;  %v605_v34 = vpop.f32.mrf.mxu0 }
 0x38d   :  { %v612_v35 = vadd.f32 %v611_v32, %v610_v31  ;;  %v797_v36 = vpop.f32.mrf.mxu0 }
 0x38f   :  { %v613_v37 = vrot.slane %v612_v35, 2 }
 0x391   :  { %v614_v38 = vadd.f32 %v613_v37, %v612_v35 }
 0x393   :  { %v615_v39 = vrot.slane %v614_v38, 1 }
 0x395   :  { %v616_v40 = vadd.f32 %v615_v39, %v614_v38 }
 0x397   :  { %v617_v41 = vmul.f32 0.5, %v616_v40 }
 0x399   :  { %v618_v42 = vsub.f32 %v603_v29, %v617_v41 }
 0x39b   :  { %v619_v43 = vmul.f32 %v618_v42, %v618_v42 }
 0x39d   :  { %v620_v44 = vsel %vm319_vm8, %v619_v43, 0.0 }
 0x39e   :  { %v621_v45 = vrot.slane %v620_v44, 4 }
 0x3a0   :  { %v622_v46 = vadd.f32 %v621_v45, %v620_v44 }
 0x3a2   :  { %v623_v47 = vrot.slane %v622_v46, 2 }
 0x3a4   :  { %v624_v48 = vadd.f32 %v623_v47, %v622_v46 }
 0x3a6   :  { %v625_v49 = vrot.slane %v624_v48, 1 }
 0x3a8   :  { %v626_v50 = vadd.f32 %v625_v49, %v624_v48 }
 0x3aa   :  { %v627_v51 = vmul.f32 0.5, %v626_v50 }
 0x3ac   :  { %v628_v52 = vadd.f32 1e-05, %v627_v51 }
 0x3ae   :  { %824 = vrsqrt.f32 %v628_v52 }
 0x3bb   :  { %v825_v53 = vpop.eup %824 }
 0x3bc   :  { %v630_v55 = vmul.f32 %v825_v53, %v618_v42 }
 0x3be   :  { %v635_v57 = vmul.f32 %v724_v54, %v630_v55 }
 0x3c0   :  { %v640_v58 = vadd.f32 %v725_v56, %v635_v57 }
 0x3c2   :  { %v641_v60 = vmax.f32 %v640_v58, 0.0 }
 0x3c4   :  { %v647_v61 = vmul.f32 %v726_v59, %v641_v60 }
 0x3c6   :  { %v648_v62 = vsel %vm319_vm8, %v647_v61, 0.0 }
 0x3c7   :  { %649 = vadd.xlane.f32.xlu0 %v648_v62 }
 0x3c8   :  { %849 = shalt.err (!%p846_p9)
}
 0x3c9   :  { %674 = dma.vmem_to_hbm [thread:$0]  %s672_s14, 32, %s1115_s7, [#allocation3]   ;;  %vm661_vm9 = vcmask 1024  }
 0x3ca   :  { %s727_s5 = sld [smem:[#allocation2 + $0x2]] }
 0x3cb   :  { %s655_s16 = sld [smem:[#allocation2]] }
 0x3cc   :  { %s728_s17 = sld [smem:[#allocation2 + $0x1]] }
 0x3d0   :  { %v652_v63 = vstv %s727_s5 }
 0x3d1   :  { %v657_v2 = vstv %s655_s16 }
 0x3d2   :  { %v659_v4 = vstv %s728_s17 }
 0x450   :  { %v650_v0 = vpop.xlane.xlu0 %649 }
 0x451   :  { %v653_v1 = vadd.f32 %v652_v63, %v650_v0 }
 0x453   :  { %v654_v3 = vmax.f32 %v653_v1, 0.0 }
 0x455   :  { %v658_v5 = vmax.f32 %v657_v2, %v654_v3 }
 0x457   :  { %v660_v6 = vmin.f32 %v659_v4, %v658_v5 }
 0x459   :  { %662 = vst.msk [vmem:[%s1114_s6] sm:$0x3] %vm661_vm9, %v660_v6 }
 0x45a   :  { %860 = dma.done.wait [#allocation3], 32  }
 0x45b   :  { %861 = vsyncadd [#allocation3], 4294967264 }
 0x45c   :  { %680 = vsyncpa [#allocation3], 1 }
 0x45d   :  { %681 = vsyncpa [#allocation4], 1 }

</bundles_post_ra>
